<compile_context>
chip_gen: v7x
topology: tpu7x:2x2x1
jax: 0.10.0
libtpu: 0.0.40
codegen_flags: <defaults>
</compile_context>

<pallas_src>
import jax
import jax.numpy as jnp
from jax.experimental import pallas as pl
from jax.experimental.pallas import tpu as pltpu


def _round_up(a, b):
    return (a + b - 1) // b * b


def _chip_profile():
    """Returns (small_vmem, n_tensorcores) with conservative fallbacks."""
    vmem_cap = None
    try:
        vmem_cap = int(getattr(pltpu.get_tpu_info(), "vmem_capacity_bytes", 0)) or None
    except Exception:
        vmem_cap = None
    kind = ""
    try:
        kind = jax.devices()[0].device_kind.lower()
    except Exception:
        pass
    is_v7 = ("v7" in kind) or ("7x" in kind)
    if vmem_cap is None:
        vmem_cap = 64 << 20                      # conservative default
    small_vmem = is_v7 or (vmem_cap <= (80 << 20))   # v7x-class (64 MiB / TC)
    n_cores = 2 if is_v7 else 1                  # v7x: 2 TCs share "parallel" axes
    return small_vmem, n_cores


def _make_se_kernel(hw, hw_tile, chunk, need_mask):
    """Kernel factory; true HW (for the mean divisor and the lane mask) is static."""
    inv_hw = 1.0 / float(hw)
    n_chunks = max(1, hw_tile // chunk)

    def kernel(x_ref, w1_ref, b1_ref, w2_ref, b2_ref, o_ref, acc_ref):
        # x_ref:  (b_tile, C, hw_tile)  native dtype
        # w1_ref: (C, hidden)  b1_ref: (1, hidden)
        # w2_ref: (hidden, C)  b2_ref: (1, C)
        # o_ref:  (1, b_tile, C)
        # acc_ref:(b_tile, C) f32 streaming pooled-sum accumulator
        s = pl.program_id(1)
        n_s = pl.num_programs(1)

        @pl.when(s == 0)
        def _init():
            acc_ref[...] = jnp.zeros_like(acc_ref)

        b_tile, C = acc_ref.shape
        if need_mask:
            lane = jax.lax.broadcasted_iota(jnp.int32, (1, 1, chunk), 2)
            base = s * hw_tile

        # Reduce this spatial tile chunk-by-chunk; only (b_tile, C) stays live.
        psum = jnp.zeros((b_tile, C), jnp.float32)
        for j in range(n_chunks):
            xc = x_ref[:, :, j * chunk:(j + 1) * chunk].astype(jnp.float32)
            if need_mask:
                # Lanes at global index >= HW are unspecified data -> zero them.
                xc = jnp.where(lane < (hw - base - j * chunk), xc, 0.0)
            psum = psum + jnp.sum(xc, axis=-1)
        acc_ref[...] += psum

        @pl.when(s == n_s - 1)
        def _finalize():
            pooled = acc_ref[...] * jnp.float32(inv_hw)            # (b_tile, C) f32
            # Feed weights in their native dtype (no f32 weight copies in VMEM).
            h = jnp.dot(pooled.astype(w1_ref.dtype), w1_ref[...],
                        preferred_element_type=jnp.float32)
            h = h + b1_ref[...].astype(jnp.float32)
            h = h * jax.nn.sigmoid(h)                              # Swish
            y = jnp.dot(h.astype(w2_ref.dtype), w2_ref[...],
                        preferred_element_type=jnp.float32)
            y = y + b2_ref[...].astype(jnp.float32)
            o_ref[0] = jax.nn.sigmoid(y).astype(o_ref.dtype)

    return kernel


def se_block_forward(x, w1, b1, w2, b2, *, hw_tile=None, b_tile=None):
    """x: (B, C, H, W) NCHW.  Returns the (B, C, 1, 1) excitation weights."""
    B, C, H, W = x.shape
    hidden = w1.shape[1]
    HW = H * W
    isz = jnp.dtype(x.dtype).itemsize
    wsz = jnp.dtype(w1.dtype).itemsize

    small_vmem, n_cores = _chip_profile()
    vmem_cap_target = (52 << 20) if small_vmem else (100 << 20)

    # --- Spatial (reduction) tile: multiple of 128, never wider than HW -----
    if HW <= 128:
        hw_tile = HW                                   # full-extent block, 1 step
    else:
        want = (1024 if small_vmem else 2048) if hw_tile is None else hw_tile
        hw_tile = min(max(_round_up(want, 128), 128), (HW // 128) * 128)

    # --- Batch tile (leading block dim; no (8,128) constraint, 3-D output) --
    if b_tile is None:
        if B <= 8:
            b_tile = max(1, -(-B // n_cores))          # >=2 parallel tiles on v7x
        else:
            b_tile = min(B, 8 if small_vmem else 16)
    b_tile = max(1, min(b_tile, B))

    # --- Fit the double-buffered x stream + resident weights in VMEM --------
    # Constant-index weight blocks are still double-buffered by the pipeline.
    weight_bytes = 2 * (C * hidden + hidden + hidden * C + C) * wsz
    # TODO(synk): for very large C (hidden = C*r), move the FC epilogue into a
    # separate op so the weights need not be VMEM-resident in this kernel.
    x_budget = (14 << 20) if small_vmem else (56 << 20)
    x_budget = min(x_budget, max(vmem_cap_target - weight_bytes - (8 << 20), 2 << 20))

    def _x_bytes(bt, ht):
        return 2 * bt * C * ht * isz                   # double-buffered x stream

    while _x_bytes(b_tile, hw_tile) > x_budget and hw_tile > 128:
        hw_tile = max(128, (hw_tile // 2) // 128 * 128)
    while _x_bytes(b_tile, hw_tile) > x_budget and b_tile > 1:
        b_tile = max(1, b_tile // 2)

    grid = (pl.cdiv(B, b_tile), pl.cdiv(HW, hw_tile))
    n_btiles = grid[0]
    need_mask = (HW % hw_tile) != 0
    chunk = 512 if (hw_tile % 512 == 0) else (128 if (hw_tile % 128 == 0) else hw_tile)

    # Layout plumbing only (metadata reshape of contiguous NCHW; no HBM copy).
    x_flat = x.reshape(B, C, HW)
    b1_2d = b1.reshape(1, hidden)
    b2_2d = b2.reshape(1, C)

    vmem_needed = (_x_bytes(b_tile, hw_tile)                              # x stream
                   + weight_bytes                                         # weights
                   + _round_up(b_tile, 8) * _round_up(C, 128) * 4         # accumulator
                   + 2 * _round_up(b_tile, 8) * _round_up(C, 128) * isz   # out buffers
                   + b_tile * C * chunk * 4                               # chunk temps
                   + 2 * b_tile * (hidden + C) * 4)                       # epilogue temps
    vmem_limit = int(min(max(vmem_needed + (6 << 20), 32 << 20), vmem_cap_target))

    cost = pl.CostEstimate(
        flops=B * C * HW + 4 * B * C * hidden,
        transcendentals=2 * B * (hidden + C),
        bytes_accessed=(B * C * HW * isz
                        + (2 * C * hidden + hidden + C) * wsz
                        + B * C * isz),
    )

    kernel = _make_se_kernel(HW, hw_tile, chunk, need_mask)

    out = pl.pallas_call(
        kernel,
        out_shape=jax.ShapeDtypeStruct((n_btiles, b_tile, C), x.dtype),
        grid_spec=pltpu.PrefetchScalarGridSpec(
            num_scalar_prefetch=0,
            grid=grid,
            in_specs=[
                # Streamed activation tile (ragged last blocks handled in-kernel).
                pl.BlockSpec((b_tile, C, hw_tile), lambda b, s: (b, 0, s)),
                # Weights/biases: constant block index -> fetched once, resident.
                pl.BlockSpec((C, hidden), lambda b, s: (0, 0)),
                pl.BlockSpec((1, hidden), lambda b, s: (0, 0)),
                pl.BlockSpec((hidden, C), lambda b, s: (0, 0)),
                pl.BlockSpec((1, C), lambda b, s: (0, 0)),
            ],
            # Output block constant across the reduction axis (accumulator pattern);
            # 3-D layout keeps the block legal for any b_tile (incl. ceil(B/2)).
            out_specs=pl.BlockSpec((1, b_tile, C), lambda b, s: (b, 0, 0)),
            scratch_shapes=[pltpu.VMEM((b_tile, C), jnp.float32)],
        ),
        compiler_params=pltpu.CompilerParams(
            dimension_semantics=("parallel", "arbitrary"),
            vmem_limit_bytes=vmem_limit,
        ),
        cost_estimate=cost,
    )(x_flat, w1, b1_2d, w2, b2_2d)

    return out.reshape(n_btiles * b_tile, C)[:B].reshape(B, C, 1, 1)


def init_params(key, in_channels, r=4, dtype=jnp.float32):
    """Deterministic init matching nn.Linear shapes (stored as (in, out))."""
    hidden = in_channels * r
    k1, k2, k3, k4 = jax.random.split(key, 4)
    lim1 = 1.0 / (in_channels ** 0.5)
    lim2 = 1.0 / (hidden ** 0.5)
    w1 = jax.random.uniform(k1, (in_channels, hidden), dtype, -lim1, lim1)
    b1 = jax.random.uniform(k2, (hidden,), dtype, -lim1, lim1)
    w2 = jax.random.uniform(k3, (hidden, in_channels), dtype, -lim2, lim2)
    b2 = jax.random.uniform(k4, (in_channels,), dtype, -lim2, lim2)
    return w1, b1, w2, b2


def se_block_reference(x, w1, b1, w2, b2):
    """Pure-JAX reference for correctness check."""
    pooled = jnp.mean(x.astype(jnp.float32), axis=(2, 3))
    h = pooled @ w1.astype(jnp.float32) + b1
    h = h * jax.nn.sigmoid(h)
    y = h @ w2.astype(jnp.float32) + b2
    return jax.nn.sigmoid(y)[:, :, None, None].astype(x.dtype)


def _check(B, C, H, W, r, key, **fwd_kwargs):
    kx, kp = jax.random.split(key)
    x = jax.random.normal(kx, (B, C, H, W), jnp.float32)
    w1, b1, w2, b2 = init_params(kp, C, r)
    out = jax.block_until_ready(se_block_forward(x, w1, b1, w2, b2, **fwd_kwargs))
    ref = se_block_reference(x, w1, b1, w2, b2)
    assert out.shape == (B, C, 1, 1), out.shape
    assert jnp.allclose(out, ref, atol=1e-4, rtol=1e-4), (
        f"max err {jnp.max(jnp.abs(out - ref))}")


if __name__ == "__main__":
    key = jax.random.PRNGKey(0)
    k1, k2 = jax.random.split(key)

    # Small aligned case: B=2, C=4, 16x16 spatial (single spatial grid step).
    _check(2, 4, 16, 16, 4, k1)

    # Unaligned case: HW=289, hw_tile=128 -> 3 reduction steps, in-kernel lane
    # mask on the ragged last tile, ragged batch tile (no host-side padding).
    _check(3, 8, 17, 17, 4, k2, hw_tile=128)

    print("KERNEL_OK")
</pallas_src>

<mosaic_0001>
module attributes {stable_mosaic.version = 11 : i64} {
  func.func @kernel(%arg0: i32, %arg1: i32, %arg2: memref<2x4x256xf32, #tpu.memory_space<vmem>>, %arg3: memref<4x16xf32, #tpu.memory_space<vmem>>, %arg4: memref<1x16xf32, #tpu.memory_space<vmem>>, %arg5: memref<16x4xf32, #tpu.memory_space<vmem>>, %arg6: memref<1x4xf32, #tpu.memory_space<vmem>>, %arg7: memref<1x2x4xf32, #tpu.memory_space<vmem>>, %arg8: memref<2x4xf32, #tpu.memory_space<vmem>>) attributes {dimension_semantics = [#tpu.dimension_semantics<parallel>, #tpu.dimension_semantics<arbitrary>], iteration_bounds = array<i64: 1, 1>, scalar_prefetch = 0 : i64, scratch_operands = 1 : i64, tpu.core_type = #tpu.core_type<tc>, window_params = [{transform_indices = @transform_0, window_bounds = array<i64: 2, 4, 256>}, {pipeline_mode = #tpu.pipeline_mode<synchronous>, transform_indices = @transform_1, window_bounds = array<i64: 4, 16>}, {pipeline_mode = #tpu.pipeline_mode<synchronous>, transform_indices = @transform_2, window_bounds = array<i64: 1, 16>}, {pipeline_mode = #tpu.pipeline_mode<synchronous>, transform_indices = @transform_3, window_bounds = array<i64: 16, 4>}, {pipeline_mode = #tpu.pipeline_mode<synchronous>, transform_indices = @transform_4, window_bounds = array<i64: 1, 4>}, {transform_indices = @transform_5, window_bounds = array<i64: 1, 2, 4>}]} {
    %c0_i32 = arith.constant 0 : i32
    %0 = arith.cmpi eq, %arg1, %c0_i32 : i32
    %1 = arith.extui %0 : i1 to i32
    %c0_i32_0 = arith.constant 0 : i32
    %2 = arith.cmpi ne, %1, %c0_i32_0 : i32
    scf.if %2 {
      %cst_13 = arith.constant 0.000000e+00 : f32
      %16 = vector.broadcast %cst_13 : f32 to vector<2x4xf32>
      %c0_14 = arith.constant 0 : index
      %c0_15 = arith.constant 0 : index
      %17 = vector.load %arg8[%c0_14, %c0_15] : memref<2x4xf32, #tpu.memory_space<vmem>>, vector<2x4xf32>
      tpu.vector_store %arg8[%c0_14, %c0_15], %16 {strides = array<i32>} : memref<2x4xf32, #tpu.memory_space<vmem>>, vector<2x4xf32>,
    } else {
    }
    %cst = arith.constant 0.000000e+00 : f32
    %3 = vector.broadcast %cst : f32 to vector<2x4xf32>
    %c0 = arith.constant 0 : index
    %c0_1 = arith.constant 0 : index
    %c0_2 = arith.constant 0 : index
    %4 = vector.load %arg2[%c0, %c0_1, %c0_2] : memref<2x4x256xf32, #tpu.memory_space<vmem>>, vector<2x4x128xf32>
    %cst_3 = arith.constant dense<0.000000e+00> : vector<2x4xf32>
    %5 = vector.multi_reduction <add>, %4, %cst_3 [2] : vector<2x4x128xf32> to vector<2x4xf32>
    %6 = arith.addf %3, %5 : vector<2x4xf32>
    %c0_4 = arith.constant 0 : index
    %c0_5 = arith.constant 0 : index
    %c128 = arith.constant 128 : index
    %7 = vector.load %arg2[%c0_4, %c0_5, %c128] : memref<2x4x256xf32, #tpu.memory_space<vmem>>, vector<2x4x128xf32>
    %cst_6 = arith.constant dense<0.000000e+00> : vector<2x4xf32>
    %8 = vector.multi_reduction <add>, %7, %cst_6 [2] : vector<2x4x128xf32> to vector<2x4xf32>
    %9 = arith.addf %6, %8 : vector<2x4xf32>
    %c0_7 = arith.constant 0 : index
    %c0_8 = arith.constant 0 : index
    %10 = vector.load %arg8[%c0_7, %c0_8] : memref<2x4xf32, #tpu.memory_space<vmem>>, vector<2x4xf32>
    %11 = arith.addf %10, %9 : vector<2x4xf32>
    %c0_9 = arith.constant 0 : index
    %c0_10 = arith.constant 0 : index
    %12 = vector.load %arg8[%c0_9, %c0_10] : memref<2x4xf32, #tpu.memory_space<vmem>>, vector<2x4xf32>
    tpu.vector_store %arg8[%c0_9, %c0_10], %11 {strides = array<i32>} : memref<2x4xf32, #tpu.memory_space<vmem>>, vector<2x4xf32>,
    %c0_i32_11 = arith.constant 0 : i32
    %13 = arith.cmpi eq, %arg1, %c0_i32_11 : i32
    %14 = arith.extui %13 : i1 to i32
    %c0_i32_12 = arith.constant 0 : i32
    %15 = arith.cmpi ne, %14, %c0_i32_12 : i32
    scf.if %15 {
      %c0_13 = arith.constant 0 : index
      %c0_14 = arith.constant 0 : index
      %16 = vector.load %arg8[%c0_13, %c0_14] : memref<2x4xf32, #tpu.memory_space<vmem>>, vector<2x4xf32>
      %cst_15 = arith.constant 3.906250e-03 : f32
      %17 = vector.broadcast %cst_15 : f32 to vector<2x4xf32>
      %18 = arith.mulf %16, %17 : vector<2x4xf32>
      %c0_16 = arith.constant 0 : index
      %c0_17 = arith.constant 0 : index
      %19 = vector.load %arg3[%c0_16, %c0_17] : memref<4x16xf32, #tpu.memory_space<vmem>>, vector<4x16xf32>
      %cst_18 = arith.constant dense<0.000000e+00> : vector<2x16xf32>
      %20 = tpu.matmul %18, %19, %cst_18 {dimension_numbers = #tpu.dot_dimension_numbers<[1], [0], [0], [1], [0, 0, 1, 1], [], []>} : vector<2x4xf32>, vector<4x16xf32>, vector<2x16xf32> -> vector<2x16xf32>
      %c0_19 = arith.constant 0 : index
      %c0_20 = arith.constant 0 : index
      %21 = vector.load %arg4[%c0_19, %c0_20] : memref<1x16xf32, #tpu.memory_space<vmem>>, vector<1x16xf32>
      %22 = vector.broadcast %21 : vector<1x16xf32> to vector<2x16xf32>
      %23 = arith.addf %20, %22 : vector<2x16xf32>
      %24 = arith.negf %23 : vector<2x16xf32>
      %25 = math.exp %24 : vector<2x16xf32>
      %cst_21 = arith.constant 1.000000e+00 : f32
      %26 = vector.broadcast %cst_21 : f32 to vector<2x16xf32>
      %27 = arith.addf %26, %25 : vector<2x16xf32>
      %28 = arith.divf %26, %27 : vector<2x16xf32>
      %29 = arith.mulf %23, %28 : vector<2x16xf32>
      %c0_22 = arith.constant 0 : index
      %c0_23 = arith.constant 0 : index
      %30 = vector.load %arg5[%c0_22, %c0_23] : memref<16x4xf32, #tpu.memory_space<vmem>>, vector<16x4xf32>
      %cst_24 = arith.constant dense<0.000000e+00> : vector<2x4xf32>
      %31 = tpu.matmul %29, %30, %cst_24 {dimension_numbers = #tpu.dot_dimension_numbers<[1], [0], [0], [1], [0, 0, 1, 1], [], []>} : vector<2x16xf32>, vector<16x4xf32>, vector<2x4xf32> -> vector<2x4xf32>
      %c0_25 = arith.constant 0 : index
      %c0_26 = arith.constant 0 : index
      %32 = vector.load %arg6[%c0_25, %c0_26] : memref<1x4xf32, #tpu.memory_space<vmem>>, vector<1x4xf32>
      %33 = vector.broadcast %32 : vector<1x4xf32> to vector<2x4xf32>
      %34 = arith.addf %31, %33 : vector<2x4xf32>
      %35 = arith.negf %34 : vector<2x4xf32>
      %36 = math.exp %35 : vector<2x4xf32>
      %cst_27 = arith.constant 1.000000e+00 : f32
      %37 = vector.broadcast %cst_27 : f32 to vector<2x4xf32>
      %38 = arith.addf %37, %36 : vector<2x4xf32>
      %39 = arith.divf %37, %38 : vector<2x4xf32>
      %c0_28 = arith.constant 0 : index
      %c0_29 = arith.constant 0 : index
      %c0_30 = arith.constant 0 : index
      %40 = vector.load %arg7[%c0_28, %c0_29, %c0_30] : memref<1x2x4xf32, #tpu.memory_space<vmem>>, vector<1x2x4xf32>
      %41 = vector.shape_cast %40 : vector<1x2x4xf32> to vector<2x4xf32>
      %42 = vector.shape_cast %39 : vector<2x4xf32> to vector<1x2x4xf32>
      tpu.vector_store %arg7[%c0_28, %c0_29, %c0_30], %42 {strides = array<i32>} : memref<1x2x4xf32, #tpu.memory_space<vmem>>, vector<1x2x4xf32>,
    } else {
    }
    return
  }
  func.func @transform_0(%arg0: i32, %arg1: i32) -> (i32, i32, i32) {
    %c0_i32 = arith.constant 0 : i32
    %c0_i32_0 = arith.constant 0 : i32
    return %arg0, %c0_i32, %arg1 : i32, i32, i32
  }
  func.func @transform_1(%arg0: i32, %arg1: i32) -> (i32, i32) {
    %c0_i32 = arith.constant 0 : i32
    %c0_i32_0 = arith.constant 0 : i32
    %c0_i32_1 = arith.constant 0 : i32
    return %c0_i32, %c0_i32_0 : i32, i32
  }
  func.func @transform_2(%arg0: i32, %arg1: i32) -> (i32, i32) {
    %c0_i32 = arith.constant 0 : i32
    %c0_i32_0 = arith.constant 0 : i32
    %c0_i32_1 = arith.constant 0 : i32
    return %c0_i32, %c0_i32_0 : i32, i32
  }
  func.func @transform_3(%arg0: i32, %arg1: i32) -> (i32, i32) {
    %c0_i32 = arith.constant 0 : i32
    %c0_i32_0 = arith.constant 0 : i32
    %c0_i32_1 = arith.constant 0 : i32
    return %c0_i32, %c0_i32_0 : i32, i32
  }
  func.func @transform_4(%arg0: i32, %arg1: i32) -> (i32, i32) {
    %c0_i32 = arith.constant 0 : i32
    %c0_i32_0 = arith.constant 0 : i32
    %c0_i32_1 = arith.constant 0 : i32
    return %c0_i32, %c0_i32_0 : i32, i32
  }
  func.func @transform_5(%arg0: i32, %arg1: i32) -> (i32, i32, i32) {
    %c0_i32 = arith.constant 0 : i32
    %c0_i32_0 = arith.constant 0 : i32
    %c0_i32_1 = arith.constant 0 : i32
    return %arg0, %c0_i32, %c0_i32_0 : i32, i32, i32
  }
}

</mosaic_0001>

<bundles_post_ra>
// kernel: tpu_custom_call.1
= control target key start
LH: loop header
LB: loop body
LE: loop exit
PB: predicated region body
PF: predicated region fallthrough
CT: control target
= control target key end

     0   :  { %vm29_vm0 = vcmask 1043456   ;;  %s412_s0 = inlined_call_operand.vmem [shape: f32[2,4,256], index: 0, kind: input, shape index: {}]   ;;  %s413_s1 = inlined_call_operand.vmem [shape: f32[4,16], index: 1, kind: input, shape index: {}]   ;;  %s414_s2 = inlined_call_operand.vmem [shape: f32[1,16], index: 2, kind: input, shape index: {}]   ;;  %s415_s3 = inlined_call_operand.vmem [shape: f32[16,4], index: 3, kind: input, shape index: {}]   ;;  %s416_s4 = inlined_call_operand.vmem [shape: f32[1,4], index: 4, kind: input, shape index: {}]   ;;  %s417_s5 = inlined_call_operand.hbm [shape: f32[1,2,4], index: 5, kind: output, shape index: {}]  }
   0x1   :  { %v38_v0 = vld [vmem:[%s412_s0 + $0x4] sm:$0xf]  ;;  %v27_v1 = vld [vmem:[%s412_s0] sm:$0xf]  ;;  %v39_v4 = vld [vmem:[%s412_s0 + $0xc] sm:$0xf] }
   0x2   :  { %v40_v2 = vsel %vm29_vm0, %v38_v0, 0.0  ;;  %v30_v3 = vsel %vm29_vm0, %v27_v1, 0.0  ;;  %v28_v5 = vld [vmem:[%s412_s0 + $0x8] sm:$0xf] }
   0x3   :  { %41 = vadd.xlane.f32.xlu1 %v40_v2  ;;  %31 = vadd.xlane.f32.xlu0 %v30_v3 }
   0x4   :  { %10 = vsyncpa [#allocation4], 0  ;;  %v43_v6 = vsel %vm29_vm0, %v39_v4, 0.0  ;;  %v33_v7 = vsel %vm29_vm0, %v28_v5, 0.0  ;;  %vm25_vm1 = vcmask 25600   ;;  %v331_v8 = vmov 0.0  }
   0x5   :  { %26 = vst.msk [vmem:[#allocation2] sm:$0x3] %vm25_vm1, %v331_v8  ;;  %280 = vmatprep.subr.mxu0 %v331_v8  ;;  %v72_v9 = vld [vmem:[%s413_s1] sm:$0xf]  ;;  %vm332_vm2 = vmmov 0   ;;  %v51_v10 = vlaneseq  ;;  %vm61_vm3 = vcmask 1041409  }
   0x6   :  { %281 = vmatpush3.msk.msra.mxu0 %vm29_vm0, %v72_v9  ;;  %282 = vmatprep.mubr.msk.f32.mxu0 %vm332_vm2, %v331_v8  ;;  %vm80_vm4 = vcmask 31744   ;;  %v164_v27 = vld [vmem:[%s415_s3] sm:$0xff]  ;;  %v165_v28 = vld [vmem:[%s415_s3 + $0x8] sm:$0xff]  ;;  %v333_v30 = vmov 0.0|0.0   ;;  %vm173_vm5 = vcmask 130048  }
   0x7   :  { %44 = vadd.xlane.f32.xlu1 %v43_v6  ;;  %34 = vadd.xlane.f32.xlu0 %v33_v7  ;;  %v52_v11 = vand.u32 127, %v51_v10  ;;  %v54_v12 = vshrl.u32 %v51_v10, 7  ;;  %v293_v29 = vpack.c.bf16 %v165_v28, %v164_v27  ;;  %v268_v31 = vld [vmem:[%s414_s2] ss:$0 sm:$0xff]  ;;  %s334_s2 = smov [#allocation3]  }
   0x8   :  { %289 = vmatprep.mubr.msk.f32.mxu1 %vm332_vm2, %v331_v8  ;;  %292 = vmatprep.subr.bf16.mxu1 %v333_v30  ;;  %v272_v40 = vld [vmem:[%s416_s4] ss:$0 sm:$0xff]  ;;  %s260_s8 = sshll.u32 %s334_s2, 4  ;;  %s261_s8 = int_to_ptr.vmem [resolvable:$true] %s260_s8 }
   0x9   :  { %v55_v15 = vsub.s32 %v52_v11, %v54_v12  ;;  %294 = vmatpush3.bf16.msra.mxu1 %v293_v29  ;;  %s307_s9 = scalar_lea.vmem %s261_s8, 32  ;;  %p312_p1 = scmp.lt.s32.totalorder %s261_s8, %s261_s8 }
   0xa   :  { %p308_p0 = scmp.ne.s32.totalorder %s261_s8, %s307_s9  ;;  %p313_p2 = scmp.lt.s32.totalorder %s307_s9, %s307_s9 }
   0xc   :  { %v48_v22 = vld [vmem:[#allocation2] sm:$0x3]  ;;  %p314_p3 = por %p313_p2, %p312_p1 }
   0xe   :  { %p315_p4 = pnand %p314_p3, %p308_p0 }
  0x90   :  { %v42_v13 = vpop.xlane.xlu1 %41  ;;  %v32_v14 = vpop.xlane.xlu0 %31 }
  0x91   :  { %v46_v16 = vadd.f32 %v42_v13, %v32_v14 }
  0x93   :  { %v56_v20 = vrot.slane %v46_v16, %v55_v15 }
  0x94   :  { %v45_v17 = vpop.xlane.xlu1 %44  ;;  %v35_v18 = vpop.xlane.xlu0 %34 }
  0x95   :  { %v47_v19 = vadd.f32 %v45_v17, %v35_v18 }
  0x97   :  { %v60_v21 = vrot.slane %v47_v19, %v55_v15 }
  0x99   :  { %v62_v23 = vsel %vm61_vm3, %v60_v21, %v56_v20 }
  0x9a   :  { %v64_v24 = vadd.f32 %v62_v23, %v48_v22 }
  0x9c   :  { %66 = vst.msk [vmem:[#allocation2] sm:$0x3] %vm25_vm1, %v64_v24 }
  0xa3   :  { %v70_v25 = vld [vmem:[#allocation2] sm:$0x3] }
  0xa4   :  { %v71_v26 = vmul.f32 0.00390625, %v70_v25 }
  0xa6   :  { %283 = vmatmul.mubr.msk.f32.vlgmr.msra.gmra.mrb[0].mxu0 %vm80_vm4, %v71_v26 }
 0x179   :  { %v153_v32 = vpop.f32.mrb[0].mxu0 }
 0x17a   :  { %v154_v33 = vadd.f32 %v268_v31, %v153_v32  ;;  %v284_v34 = vpop.f32.mrb[1].mxu0 }
 0x17c   :  { %v271_v35 = vmul.f32 -1.442695, %v154_v33 }
 0x17e   :  { %299 = vpow2.f32 %v271_v35 }
 0x188   :  { %v300_v36 = vpop.eup %299 }
 0x189   :  { %v160_v37 = vadd.f32 1.0, %v300_v36 }
 0x18b   :  { %301 = vrcp.f32 %v160_v37 }
 0x195   :  { %v302_v38 = vpop.eup %301 }
 0x196   :  { %v163_v39 = vmul.f32 %v302_v38, %v154_v33 }
 0x198   :  { %290 = vmatmul.mubr.msk.f32.vlgmr.msra.gmra.mrb[0].mxu1 %vm173_vm5, %v163_v39 }
 0x26b   :  { %v243_v41 = vpop.f32.mrb[0].mxu1 }
 0x26c   :  { %v244_v42 = vadd.f32 %v272_v40, %v243_v41  ;;  %v291_v43 = vpop.f32.mrb[1].mxu1 }
 0x26e   :  { %v274_v44 = vmul.f32 -1.442695, %v244_v42 }
 0x270   :  { %303 = vpow2.f32 %v274_v44 }
 0x27a   :  { %v304_v45 = vpop.eup %303 }
 0x27b   :  { %v250_v46 = vadd.f32 1.0, %v304_v45 }
 0x27d   :  { %305 = vrcp.f32 %v250_v46 }
 0x287   :  { %v306_v47 = vpop.eup %305 }
 0x288   :  { %253 = vst.msk [vmem:[#allocation3] sm:$0x3] %vm25_vm1, %v306_v47 }
 0x289   :  { %318 = shalt.err (!%p315_p4)
}
 0x28a   :  { %s319_s11 = scalar_lea.hbm %s417_s5, 32 }
 0x28b   :  { %p320_p5 = scmp.ne.s32.totalorder %s417_s5, %s319_s11  ;;  %p323_p6 = scmp.lt.u32.totalorder %s319_s11, %s417_s5 }
 0x28d   :  { %p325_p7 = pnand %p323_p6, %p320_p5 }
 0x28f   :  { %328 = shalt.err (!%p325_p7)
}
 0x290   :  { %263 = dma.vmem_to_hbm [thread:$0]  %s261_s8, 32, %s417_s5, [#allocation4]  }
 0x291   :  { %329 = dma.done.wait [#allocation4], 32  }
 0x292   :  { %330 = vsyncadd [#allocation4], 4294967264 }
 0x293   :  { %267 = vsyncpa [#allocation4], 1 }

</bundles_post_ra>
